<compile_context>
chip_gen: v6e
topology: v6e:2x2x1
jax: 0.10.0
libtpu: 0.0.40
codegen_flags: <defaults>
</compile_context>

<pallas_src>
import jax
import jax.numpy as jnp
from jax.experimental import pallas as pl
from jax.experimental.pallas import tpu as pltpu


def _fusion_kernel(emb_ref, att_nt_ref, att_ref, adj_ref, out_ref):
    """One row-tile of getFusionAttribute.

    emb_ref    : (tm, Dp) f32   tile of `embedding` (D zero-padded to Dp)
    att_nt_ref : (Dp, N)  bf16  pre-normalized, pre-transposed `att_embedding`
    att_ref    : (N, Dp)  bf16  `att_embedding` (second-matmul operand)
    adj_ref    : (tm, N)  int8  tile of (binary) adjacency rows
    out_ref    : (tm, Dp) f32   tile of fused attribute embedding
    """
    e = emb_ref[...]
    # F.normalize(p=2, dim=1): x / max(||x||, 1e-12) == x * rsqrt(max(sum x^2, 1e-24))
    sumsq = jnp.sum(e * e, axis=1, keepdims=True)
    e_n = (e * jax.lax.rsqrt(jnp.maximum(sumsq, 1e-24))).astype(jnp.bfloat16)

    # cosine similarity: (tm, Dp) @ (Dp, N) -> (tm, N), bf16 MXU, f32 accumulate
    sim = jnp.dot(e_n, att_nt_ref[...], preferred_element_type=jnp.float32)

    # Original op: masked = where(cos * adj != 0, cos * adj, -9e15).  With binary
    # adjacency this is where((adj != 0) & (cos != 0), cos, -9e15), which keeps the
    # PyTorch quirk (an adjacent pair whose cosine is exactly 0 gets masked) while
    # avoiding a (tm, N) float multiply.
    keep = jnp.logical_and(adj_ref[...] != 0, sim != 0.0)
    masked = jnp.where(keep, sim, jnp.full_like(sim, -9.0e15))

    # softmax along dim=1 (numerically stable)
    m = jnp.max(masked, axis=1, keepdims=True)
    ex = jnp.exp(masked - m)
    attention = ex * pl.reciprocal(jnp.sum(ex, axis=1, keepdims=True), approx=True)

    # fused attribute embedding: attention @ att_embedding (bf16 MXU, f32 accumulate)
    out_ref[...] = jnp.dot(
        attention.astype(jnp.bfloat16), att_ref[...],
        preferred_element_type=jnp.float32,
    ).astype(out_ref.dtype)


def _round_up(x, m):
    return ((x + m - 1) // m) * m


def _device_kind():
    try:
        return jax.devices()[0].device_kind.lower()
    except Exception:
        return ""


def get_fusion_attribute(embedding, att_embedding, adj_mat, *, tm=None):
    """Pallas equivalent of getAttEmb.getFusionAttribute.

    adj_mat is treated as a binary adjacency matrix (the module's use case).
    """
    embedding = embedding.astype(jnp.float32)
    att_embedding = att_embedding.astype(jnp.float32)
    M, D = embedding.shape
    N, D2 = att_embedding.shape
    assert D == D2 and adj_mat.shape == (M, N)

    kind = _device_kind()
    is_v5 = "v5" in kind
    is_v7 = "v7" in kind
    if tm is None:
        tm = 128 if is_v5 else 256

    # ---- hoisted once (outside the row-tile loop) ---------------------------
    D_pad = _round_up(D, 128)  # lane-dense layout: pad feature dim with zeros
    a_sumsq = jnp.sum(att_embedding * att_embedding, axis=1, keepdims=True)
    att_norm = att_embedding * jax.lax.rsqrt(jnp.maximum(a_sumsq, 1e-24))
    att_norm_t = jnp.pad(att_norm, ((0, 0), (0, D_pad - D))).T.astype(jnp.bfloat16)   # (Dp, N)
    att_bf16 = jnp.pad(att_embedding, ((0, 0), (0, D_pad - D))).astype(jnp.bfloat16)  # (N, Dp)
    adj_i8 = (adj_mat != 0).astype(jnp.int8)                                          # (M, N)
    emb_pad = jnp.pad(embedding, ((0, 0), (0, D_pad - D)))                            # (M, Dp)

    # ---- row tiling & padding ------------------------------------------------
    tm_eff = min(tm, _round_up(M, 8))
    if is_v7:
        # v7x has 2 TensorCores: make sure the "parallel" grid has >= 2 steps.
        while tm_eff > 8 and -(-M // tm_eff) < 2:
            tm_eff = max(8, _round_up(tm_eff // 2, 8))
    M_pad = _round_up(M, tm_eff)
    if M_pad != M:
        emb_pad = jnp.pad(emb_pad, ((0, M_pad - M), (0, 0)))
        adj_i8 = jnp.pad(adj_i8, ((0, M_pad - M), (0, 0)))

    # ---- VMEM budget (exact operand sizes, double-buffered, + softmax temps) --
    need = (
        2 * D_pad * N * 2            # resident att_norm_t (bf16)
        + 2 * N * D_pad * 2          # resident att (bf16)
        + 2 * tm_eff * D_pad * 4     # embedding tiles (f32)
        + 2 * tm_eff * N * 1         # adjacency tiles (int8)
        + 2 * tm_eff * D_pad * 4     # output tiles (f32)
        + 4 * tm_eff * N * 4         # (tm, N) f32 sim/mask/exp temporaries
    )
    cap = (56 << 20) if is_v7 else (100 << 20)
    vmem_limit = int(min(cap, max(32 << 20, need + (4 << 20))))

    grid = (M_pad // tm_eff,)
    out = pl.pallas_call(
        _fusion_kernel,
        out_shape=jax.ShapeDtypeStruct((M_pad, D_pad), jnp.float32),
        grid_spec=pltpu.PrefetchScalarGridSpec(
            num_scalar_prefetch=0,
            grid=grid,
            in_specs=[
                pl.BlockSpec((tm_eff, D_pad), lambda i: (i, 0)),   # embedding row tile
                pl.BlockSpec((D_pad, N), lambda i: (0, 0)),        # resident normalized att^T
                pl.BlockSpec((N, D_pad), lambda i: (0, 0)),        # resident att (bf16)
                pl.BlockSpec((tm_eff, N), lambda i: (i, 0)),       # adjacency row tile (int8)
            ],
            out_specs=pl.BlockSpec((tm_eff, D_pad), lambda i: (i, 0)),
        ),
        compiler_params=pltpu.CompilerParams(
            dimension_semantics=("parallel",),
            vmem_limit_bytes=vmem_limit,
        ),
    )(emb_pad, att_norm_t, att_bf16, adj_i8)

    return out[:M, :D]


def get_att_emb_forward(users_emb, items_emb, out_user_att_nets, out_item_att_nets):
    """Equivalent of getAttEmb.forward (embedding tables already materialized)."""
    out_useratt_emb = get_fusion_attribute(users_emb, items_emb, out_user_att_nets)
    out_itematt_emb = get_fusion_attribute(items_emb, users_emb, out_item_att_nets)
    return users_emb, items_emb, out_useratt_emb, out_itematt_emb


# ---------------- pure-JAX reference (PyTorch semantics) for correctness -----
def _ref_fusion(embedding, att_embedding, adj_mat):
    e = embedding / jnp.maximum(
        jnp.linalg.norm(embedding, axis=1, keepdims=True), 1e-12)
    a = att_embedding / jnp.maximum(
        jnp.linalg.norm(att_embedding, axis=1, keepdims=True), 1e-12)
    sim = (e @ a.T) * adj_mat
    masked = jnp.where(sim != 0.0, sim, jnp.full_like(sim, -9.0e15))
    att = jax.nn.softmax(masked, axis=1)
    return att @ att_embedding


if __name__ == "__main__":
    key = jax.random.PRNGKey(0)
    k_u, k_i, k_au, k_ai = jax.random.split(key, 4)

    num_users, num_items, dim = 16, 24, 32

    # nn.Embedding weights, init normal(std=0.1) -- deterministic synthetic init.
    users_emb = 0.1 * jax.random.normal(k_u, (num_users, dim), dtype=jnp.float32)
    items_emb = 0.1 * jax.random.normal(k_i, (num_items, dim), dtype=jnp.float32)

    # Binary attribute adjacency matrices.
    out_user_att_nets = jax.random.bernoulli(
        k_au, p=0.4, shape=(num_users, num_items)).astype(jnp.float32)
    out_item_att_nets = jax.random.bernoulli(
        k_ai, p=0.4, shape=(num_items, num_users)).astype(jnp.float32)

    u_emb, i_emb, out_ua, out_ia = jax.block_until_ready(
        get_att_emb_forward(users_emb, items_emb,
                            out_user_att_nets, out_item_att_nets))

    # Verify against pure-JAX f32 reference.  Tolerance accounts for the
    # intentional bf16 MXU inputs and approx softmax reciprocal.
    ref_ua = _ref_fusion(users_emb, items_emb, out_user_att_nets)
    ref_ia = _ref_fusion(items_emb, users_emb, out_item_att_nets)
    assert jnp.allclose(out_ua, ref_ua, atol=5e-3, rtol=5e-3), \
        float(jnp.max(jnp.abs(out_ua - ref_ua)))
    assert jnp.allclose(out_ia, ref_ia, atol=5e-3, rtol=5e-3), \
        float(jnp.max(jnp.abs(out_ia - ref_ia)))

    print("KERNEL_OK")
</pallas_src>

<mosaic_0001>
module attributes {stable_mosaic.version = 11 : i64} {
  func.func @_fusion_kernel(%arg0: i32, %arg1: memref<16x128xf32, #tpu.memory_space<vmem>>, %arg2: memref<128x24xbf16, #tpu.memory_space<vmem>>, %arg3: memref<24x128xbf16, #tpu.memory_space<vmem>>, %arg4: memref<16x24xi8, #tpu.memory_space<vmem>>, %arg5: memref<16x128xf32, #tpu.memory_space<vmem>>) attributes {dimension_semantics = [#tpu.dimension_semantics<parallel>], iteration_bounds = array<i64: 1>, scalar_prefetch = 0 : i64, scratch_operands = 0 : i64, tpu.core_type = #tpu.core_type<tc>, window_params = [{transform_indices = @transform_0, window_bounds = array<i64: 16, 128>}, {pipeline_mode = #tpu.pipeline_mode<synchronous>, transform_indices = @transform_1, window_bounds = array<i64: 128, 24>}, {pipeline_mode = #tpu.pipeline_mode<synchronous>, transform_indices = @transform_2, window_bounds = array<i64: 24, 128>}, {transform_indices = @transform_3, window_bounds = array<i64: 16, 24>}, {transform_indices = @transform_4, window_bounds = array<i64: 16, 128>}]} {
    %c0 = arith.constant 0 : index
    %c0_0 = arith.constant 0 : index
    %0 = vector.load %arg1[%c0, %c0_0] : memref<16x128xf32, #tpu.memory_space<vmem>>, vector<16x128xf32>
    %1 = arith.mulf %0, %0 : vector<16x128xf32>
    %cst = arith.constant dense<0.000000e+00> : vector<16xf32>
    %2 = vector.multi_reduction <add>, %1, %cst [1] : vector<16x128xf32> to vector<16xf32>
    %3 = vector.shape_cast %2 : vector<16xf32> to vector<16x1xf32>
    %cst_1 = arith.constant 1.000000e-24 : f32
    %4 = vector.broadcast %cst_1 : f32 to vector<16x1xf32>
    %5 = arith.maximumf %3, %4 : vector<16x1xf32>
    %6 = math.rsqrt %5 : vector<16x1xf32>
    %7 = vector.broadcast %6 : vector<16x1xf32> to vector<16x128xf32>
    %8 = arith.mulf %0, %7 : vector<16x128xf32>
    %9 = arith.truncf %8 : vector<16x128xf32> to vector<16x128xbf16>
    %c0_2 = arith.constant 0 : index
    %c0_3 = arith.constant 0 : index
    %10 = vector.load %arg2[%c0_2, %c0_3] : memref<128x24xbf16, #tpu.memory_space<vmem>>, vector<128x24xbf16>
    %cst_4 = arith.constant dense<0.000000e+00> : vector<16x24xf32>
    %11 = tpu.matmul %9, %10, %cst_4 {dimension_numbers = #tpu.dot_dimension_numbers<[1], [0], [0], [1], [0, 0, 1, 1], [], []>} : vector<16x128xbf16>, vector<128x24xbf16>, vector<16x24xf32> -> vector<16x24xf32>
    %c0_5 = arith.constant 0 : index
    %c0_6 = arith.constant 0 : index
    %12 = vector.load %arg4[%c0_5, %c0_6] : memref<16x24xi8, #tpu.memory_space<vmem>>, vector<16x24xi8>
    %c0_i8 = arith.constant 0 : i8
    %13 = vector.broadcast %c0_i8 : i8 to vector<16x24xi8>
    %14 = arith.cmpi ne, %12, %13 : vector<16x24xi8>
    %cst_7 = arith.constant 0.000000e+00 : f32
    %15 = vector.broadcast %cst_7 : f32 to vector<16x24xf32>
    %16 = arith.cmpf one, %11, %15 : vector<16x24xf32>
    %17 = arith.andi %14, %16 : vector<16x24xi1>
    %cst_8 = arith.constant -9.000000e+15 : f32
    %18 = vector.broadcast %cst_8 : f32 to vector<16x24xf32>
    %19 = arith.select %17, %11, %18 : vector<16x24xi1>, vector<16x24xf32>
    %cst_9 = arith.constant dense<0xFF800000> : vector<16xf32>
    %20 = vector.multi_reduction <maximumf>, %19, %cst_9 [1] : vector<16x24xf32> to vector<16xf32>
    %21 = vector.shape_cast %20 : vector<16xf32> to vector<16x1xf32>
    %22 = vector.broadcast %21 : vector<16x1xf32> to vector<16x24xf32>
    %23 = arith.subf %19, %22 : vector<16x24xf32>
    %24 = math.exp %23 : vector<16x24xf32>
    %cst_10 = arith.constant dense<0.000000e+00> : vector<16xf32>
    %25 = vector.multi_reduction <add>, %24, %cst_10 [1] : vector<16x24xf32> to vector<16xf32>
    %26 = vector.shape_cast %25 : vector<16xf32> to vector<16x1xf32>
    %27 = tpu.reciprocal %26 {approx = true} : vector<16x1xf32> -> vector<16x1xf32>
    %28 = vector.broadcast %27 : vector<16x1xf32> to vector<16x24xf32>
    %29 = arith.mulf %24, %28 : vector<16x24xf32>
    %30 = arith.truncf %29 : vector<16x24xf32> to vector<16x24xbf16>
    %c0_11 = arith.constant 0 : index
    %c0_12 = arith.constant 0 : index
    %31 = vector.load %arg3[%c0_11, %c0_12] : memref<24x128xbf16, #tpu.memory_space<vmem>>, vector<24x128xbf16>
    %cst_13 = arith.constant dense<0.000000e+00> : vector<16x128xf32>
    %32 = tpu.matmul %30, %31, %cst_13 {dimension_numbers = #tpu.dot_dimension_numbers<[1], [0], [0], [1], [0, 0, 1, 1], [], []>} : vector<16x24xbf16>, vector<24x128xbf16>, vector<16x128xf32> -> vector<16x128xf32>
    %c0_14 = arith.constant 0 : index
    %c0_15 = arith.constant 0 : index
    %33 = vector.load %arg5[%c0_14, %c0_15] : memref<16x128xf32, #tpu.memory_space<vmem>>, vector<16x128xf32>
    tpu.vector_store %arg5[%c0_14, %c0_15], %32 {strides = array<i32>} : memref<16x128xf32, #tpu.memory_space<vmem>>, vector<16x128xf32>,
    return
  }
  func.func @transform_0(%arg0: i32) -> (i32, i32) {
    %c0_i32 = arith.constant 0 : i32
    %c0_i32_0 = arith.constant 0 : i32
    return %arg0, %c0_i32 : i32, i32
  }
  func.func @transform_1(%arg0: i32) -> (i32, i32) {
    %c0_i32 = arith.constant 0 : i32
    %c0_i32_0 = arith.constant 0 : i32
    %c0_i32_1 = arith.constant 0 : i32
    return %c0_i32, %c0_i32_0 : i32, i32
  }
  func.func @transform_2(%arg0: i32) -> (i32, i32) {
    %c0_i32 = arith.constant 0 : i32
    %c0_i32_0 = arith.constant 0 : i32
    %c0_i32_1 = arith.constant 0 : i32
    return %c0_i32, %c0_i32_0 : i32, i32
  }
  func.func @transform_3(%arg0: i32) -> (i32, i32) {
    %c0_i32 = arith.constant 0 : i32
    %c0_i32_0 = arith.constant 0 : i32
    return %arg0, %c0_i32 : i32, i32
  }
  func.func @transform_4(%arg0: i32) -> (i32, i32) {
    %c0_i32 = arith.constant 0 : i32
    %c0_i32_0 = arith.constant 0 : i32
    return %arg0, %c0_i32 : i32, i32
  }
}

</mosaic_0001>

<bundles_post_ra>
// kernel: tpu_custom_call.1
= control target key start
LH: loop header
LB: loop body
LE: loop exit
PB: predicated region body
PF: predicated region fallthrough
CT: control target
= control target key end

     0   :  { %v364_v3 = vmov 0.0   ;;  %s457_s0 = inlined_call_operand.vmem [shape: f32[16,128], index: 0, kind: input, shape index: {}]   ;;  %s458_s1 = inlined_call_operand.vmem [shape: bf16[128,24], index: 1, kind: input, shape index: {}]   ;;  %s459_s2 = inlined_call_operand.vmem [shape: bf16[24,128], index: 2, kind: input, shape index: {}]   ;;  %s460_s3 = inlined_call_operand.vmem [shape: s8[16,24], index: 3, kind: input, shape index: {}]   ;;  %s461_s4 = inlined_call_operand.hbm [shape: f32[16,128], index: 4, kind: output, shape index: {}]  }
   0x1   :  { %v21_v0 = vld [vmem:[%s457_s0] sm:$0xff]  ;;  %v22_v1 = vld [vmem:[%s457_s0 + $0x8] sm:$0xff]  ;;  %286 = vmatprep.subr.bf16.mxu0 %v364_v3  ;;  %v320_v4 = vld [vmem:[%s458_s1 + $0x38] sm:$0xff]   ;;  %306 = vmatprep.subr.bf16.mxu1 %v364_v3 }
   0x2   :  { %v23_v2 = vmul.f32 %v21_v0, %v21_v0  ;;  %v321_v5 = vld [vmem:[%s458_s1 + $0x30] sm:$0xff]   ;;  %v24_v6 = vmul.f32 %v22_v1, %v22_v1  ;;  %287 = vmatpush3.bf16.msra.mxu0 %v320_v4 }
   0x3   :  { %288 = vmatprep.subr.bf16.mxu0 %v364_v3 }
   0x4   :  { %25 = vadd.xlane.f32.xlu0 %v23_v2 }
   0x6   :  { %289 = vmatpush3.bf16.msra.mxu0 %v321_v5 }
   0x8   :  { %27 = vadd.xlane.f32.xlu0 %v24_v6 }
   0x9   :  { %9 = vsyncpa [#allocation3], 0  ;;  %290 = vmatprep.subr.bf16.mxu0 %v364_v3  ;;  %v322_v7 = vld [vmem:[%s458_s1 + $0x28] sm:$0xff]   ;;  %v323_v8 = vld [vmem:[%s458_s1 + $0x20] sm:$0xff]   ;;  %vm365_vm0 = vmmov 0   ;;  %v366_v27 = vmov 0  }
   0xa   :  { %291 = vmatpush3.bf16.msra.mxu0 %v322_v7  ;;  %v324_v9 = vld [vmem:[%s458_s1 + $0x18] sm:$0xff]   ;;  %302 = vmatprep.mubr.msk.bf16.mxu0 %vm365_vm0, %v364_v3  ;;  %v325_v10 = vld [vmem:[%s458_s1 + $0x10] sm:$0xff]   ;;  %v326_v11 = vld [vmem:[%s458_s1 + $0x8] sm:$0xff]   ;;  %vm161_vm10 = vcmask 195584   ;;  %vm200_vm14 = vcmask 1043456   ;;  %s367_s14 = smov [#allocation2]  }
   0xb   :  { %292 = vmatprep.subr.bf16.mxu0 %v364_v3  ;;  %310 = vmatprep.mubr.msk.bf16.mxu1 %vm365_vm0, %v364_v3  ;;  %v327_v12 = vld [vmem:[%s458_s1] sm:$0xff]   ;;  %v328_v47 = vld [vmem:[%s459_s2 + $0x8] ss:$0 sps:$4 sm:$0xff]   ;;  %s252_s15 = sshll.u32 %s367_s14, 4  ;;  %s253_s15 = int_to_ptr.vmem [resolvable:$true] %s252_s15 }
   0xc   :  { %v141_v22 = vld [vmem:[%s460_s3] sm:$0x3]  ;;  %v142_v25 = vld [vmem:[%s460_s3 + $0x2] sm:$0x3]  ;;  %v202_v48 = vsel %vm200_vm14, %v328_v47, 0  ;;  %p347_p1 = scmp.lt.s32.totalorder %s253_s15, %s253_s15 }
   0xd   :  { %vm143_vm1 = vnez %v141_v22  ;;  %vm144_vm6 = vnez %v142_v25  ;;  %307 = vmatpush3.bf16.msra.mxu1 %v202_v48  ;;  %v329_v49 = vld [vmem:[%s459_s2] sm:$0xff]   ;;  %s342_s2 = scalar_lea.vmem %s253_s15, 256 }
   0xe   :  { %293 = vmatpush3.bf16.msra.mxu0 %v323_v8  ;;  %308 = vmatprep.subr.bf16.mxu1 %v364_v3  ;;  %p343_p0 = scmp.ne.s32.totalorder %s253_s15, %s342_s2  ;;  %p348_p2 = scmp.lt.s32.totalorder %s342_s2, %s342_s2 }
   0xf   :  { %294 = vmatprep.subr.bf16.mxu0 %v364_v3 }
  0x10   :  { %p349_p3 = por %p348_p2, %p347_p1 }
  0x11   :  { %309 = vmatpush3.bf16.msra.mxu1 %v329_v49 }
  0x12   :  { %295 = vmatpush3.bf16.msra.mxu0 %v324_v9  ;;  %p350_p4 = pnand %p349_p3, %p343_p0 }
  0x13   :  { %296 = vmatprep.subr.bf16.mxu0 %v364_v3 }
  0x16   :  { %297 = vmatpush3.bf16.msra.mxu0 %v325_v10 }
  0x17   :  { %298 = vmatprep.subr.bf16.mxu0 %v364_v3 }
  0x1a   :  { %299 = vmatpush3.bf16.msra.mxu0 %v326_v11 }
  0x1b   :  { %300 = vmatprep.subr.bf16.mxu0 %v364_v3 }
  0x1e   :  { %301 = vmatpush3.bf16.msra.mxu0 %v327_v12 }
  0x8d   :  { %v26_v13 = vpop.xlane.xlu0 %25 }
  0x8e   :  { %v29_v14 = vmax.f32 %v26_v13, 1e-24 }
  0x90   :  { %330 = vrsqrt.f32 %v29_v14 }
  0x91   :  { %v28_v15 = vpop.xlane.xlu0 %27 }
  0x92   :  { %v30_v16 = vmax.f32 %v28_v15, 1e-24 }
  0x94   :  { %332 = vrsqrt.f32 %v30_v16 }
  0x9d   :  { %v331_v17 = vpop.eup %330 }
  0x9e   :  { %v33_v19 = vmul.f32 %v331_v17, %v21_v0 }
  0xa1   :  { %v333_v18 = vpop.eup %332 }
  0xa2   :  { %v34_v20 = vmul.f32 %v333_v18, %v22_v1 }
  0xa4   :  { %v35_v21 = vpack.c.bf16 %v34_v20, %v33_v19 }
  0xa6   :  { %303 = vmatmul.mubr.bf16.vlgmr.msra.gmra.mxu0 %v35_v21 }
 0x166   :  { %v134_v23 = vpop.f32.mrf.mxu0 }
 0x167   :  { %vm145_vm2 = vcmp.ne.f32.partialorder %v134_v23, 0.0 }
 0x168   :  { %vm147_vm3 = vmpackc.low %vm145_vm2, %vm145_vm2  ;;  %v304_v24 = vpop.f32.mrf.mxu0 }
 0x169   :  { %vm148_vm4 = vmpackc.even %vm147_vm3, %vm147_vm3 }
 0x16a   :  { %vm151_vm5 = vmand %vm143_vm1, %vm148_vm4  ;;  %v137_v26 = vpop.f32.mrf.mxu0 }
 0x16b   :  { %vm146_vm7 = vcmp.ne.f32.partialorder %v137_v26, 0.0  ;;  %v153_v28 = vsel %vm151_vm5, 16843009, %v366_v27 }
 0x16c   :  { %vm149_vm8 = vmpackc.low %vm146_vm7, %vm146_vm7  ;;  %v305_v29 = vpop.f32.mrf.mxu0  ;;  %v155_v30 = vunpack.c.0.s8 %v153_v28 }
 0x16d   :  { %vm150_vm9 = vmpackc.even %vm149_vm8, %vm149_vm8 }
 0x16e   :  { %vm152_vm11 = vmand %vm144_vm6, %vm150_vm9  ;;  %vm157_vm12 = vcmp.ne.s32.totalorder %v155_v30, 0 }
 0x16f   :  { %v159_v31 = vsel %vm157_vm12, %v134_v23, -9e+15  ;;  %v154_v32 = vsel %vm152_vm11, 16843009, %v366_v27 }
 0x170   :  { %v162_v33 = vsel %vm161_vm10, %v159_v31, -inf  ;;  %v156_v34 = vunpack.c.0.s8 %v154_v32 }
 0x171   :  { %163 = vmax.xlane.f32.xlu1 %v162_v33 }
 0x172   :  { %vm158_vm13 = vcmp.ne.s32.totalorder %v156_v34, 0 }
 0x173   :  { %v160_v35 = vsel %vm158_vm13, %v137_v26, -9e+15 }
 0x174   :  { %v165_v36 = vsel %vm161_vm10, %v160_v35, -inf }
 0x175   :  { %166 = vmax.xlane.f32.xlu1 %v165_v36 }
 0x1fa   :  { %v164_v37 = vpop.xlane.xlu1 %163 }
 0x1fb   :  { %v168_v38 = vsub.f32 %v159_v31, %v164_v37 }
 0x1fd   :  { %v170_v39 = vmul.f32 1.442695, %v168_v38 }
 0x1fe   :  { %v167_v40 = vpop.xlane.xlu1 %166 }
 0x1ff   :  { %334 = vpow2.f32 %v170_v39  ;;  %v169_v41 = vsub.f32 %v160_v35, %v167_v40 }
 0x201   :  { %v172_v42 = vmul.f32 1.442695, %v169_v41 }
 0x203   :  { %336 = vpow2.f32 %v172_v42 }
 0x20c   :  { %v335_v43 = vpop.eup %334 }
 0x20d   :  { %v174_v44 = vsel %vm161_vm10, %v335_v43, 0.0 }
 0x20e   :  { %175 = vadd.xlane.f32.xlu0 %v174_v44 }
 0x210   :  { %v337_v45 = vpop.eup %336 }
 0x211   :  { %v177_v46 = vsel %vm161_vm10, %v337_v45, 0.0 }
 0x212   :  { %178 = vadd.xlane.f32.xlu1 %v177_v46 }
 0x297   :  { %v176_v50 = vpop.xlane.xlu0 %175 }
 0x298   :  { %338 = vrcp.f32 %v176_v50 }
 0x29b   :  { %v179_v51 = vpop.xlane.xlu1 %178 }
 0x29c   :  { %340 = vrcp.f32 %v179_v51 }
 0x2a5   :  { %v339_v52 = vpop.eup %338 }
 0x2a6   :  { %v182_v54 = vmul.f32 %v339_v52, %v335_v43 }
 0x2a9   :  { %v341_v53 = vpop.eup %340 }
 0x2aa   :  { %v183_v55 = vmul.f32 %v341_v53, %v337_v45 }
 0x2ac   :  { %v184_v56 = vpack.c.bf16 %v183_v55, %v182_v54 }
 0x2ae   :  { %311 = vmatmul.mubr.msk.bf16.vlgmr.msra.gmra.mxu1 %vm161_vm10, %v184_v56 }
 0x36e   :  { %v238_v57 = vpop.f32.mrf.mxu1 }
 0x36f   :  { %245 = vst [vmem:[#allocation2] sm:$0xff] %v238_v57 }
 0x370   :  { %v312_v58 = vpop.f32.mrf.mxu1 }
 0x372   :  { %v241_v59 = vpop.f32.mrf.mxu1 }
 0x373   :  { %246 = vst [vmem:[#allocation2 + $0x8] sm:$0xff] %v241_v59 }
 0x374   :  { %v313_v60 = vpop.f32.mrf.mxu1 }
 0x375   :  { %353 = shalt.err (!%p350_p4)
}
 0x376   :  { %s368_s16 = smov 128   ;;  %s369_s17 = smov 8  }
 0x377   :  { %258 = dma.vmem_to_hbm [thread:$0]  %s253_s15, 256, %s461_s4, [#allocation3], %s368_s16, %s368_s16, %s369_s17  }
 0x378   :  { %362 = dma.done.wait [#allocation3], 256  }
 0x379   :  { %363 = vsyncadd [#allocation3], 4294967040 }
 0x37a   :  { %262 = vsyncpa [#allocation3], 1 }

</bundles_post_ra>
